<compile_context>
chip_gen: v5e
topology: v5e:2x2
jax: 0.10.0
libtpu: 0.0.40
codegen_flags: <defaults>
</compile_context>

<pallas_src>
import jax
import jax.numpy as jnp
import numpy as np
from jax.experimental import pallas as pl
from jax.experimental.pallas import tpu as pltpu


def _unlabeled_matching_kernel(f_ref, qt_ref, o_ref):
    # f_ref:  [N, feat_len]        full features block, resident across grid
    # qt_ref: [feat_len, tq]       pre-transposed queue tile (native MXU RHS)
    # o_ref:  [N, tq]              scores tile (f32)
    o_ref[...] = jnp.dot(
        f_ref[...], qt_ref[...], preferred_element_type=jnp.float32
    )


def _pick_tq(queue_size):
    """Choose the queue-tile width (last dim of the RHS / output block)."""
    if queue_size % 128 != 0:
        # Layout constraint: last block dim must be a multiple of 128 or the
        # full array extent. Fall back to a single full-width tile.
        return queue_size
    if queue_size <= 4096:
        # Tiny problem: one grid step, whole queue resident in VMEM.
        # (e.g. 4096x256 f32 queue tile = 4 MiB; double-buffered 8 MiB still
        #  fits comfortably inside the default scoped VMEM on v5e/v6e/v7x.)
        return queue_size
    # Large (real OIM) queues: big tiles amortize per-step overhead and DMA
    # setup while keeping 2x double-buffered tiles well under the v7x 64 MiB
    # physical VMEM budget (2 * 2048 * feat_len * 4B ~= 4 MiB at feat_len=256).
    for cand in (2048, 1024, 512, 256, 128):
        if queue_size % cand == 0:
            return cand
    return queue_size


def unlabeled_matching_forward(features, queue_t, *, tq=None):
    """scores = features @ queue_t  where queue_t is the pre-transposed queue.

    features: [N, feat_len]
    queue_t : [feat_len, queue_size]
    returns : [N, queue_size] float32
    """
    n, feat_len = features.shape
    feat_len_q, queue_size = queue_t.shape
    assert feat_len == feat_len_q

    if tq is None:
        tq = _pick_tq(queue_size)
    assert queue_size % tq == 0

    grid = (queue_size // tq,)

    cost = pl.CostEstimate(
        flops=2 * n * feat_len * queue_size,
        transcendentals=0,
        bytes_accessed=(
            n * feat_len * features.dtype.itemsize
            + feat_len * queue_size * queue_t.dtype.itemsize
            + n * queue_size * 4
        ),
    )

    return pl.pallas_call(
        _unlabeled_matching_kernel,
        out_shape=jax.ShapeDtypeStruct((n, queue_size), jnp.float32),
        grid_spec=pl.GridSpec(
            grid=grid,
            in_specs=[
                # features: one block covering all proposals, reused every step
                pl.BlockSpec((n, feat_len), lambda j: (0, 0)),
                # queue (pre-transposed): [feat_len, tq] tile -> native MXU RHS
                pl.BlockSpec((feat_len, tq), lambda j: (0, j)),
            ],
            out_specs=pl.BlockSpec((n, tq), lambda j: (0, j)),
        ),
        compiler_params=pltpu.CompilerParams(
            # Queue-tile axis is fully independent; on v7x (2 TCs) a >1-step
            # grid lets each core stream half the queue.
            dimension_semantics=("parallel",),
        ),
        cost_estimate=cost,
    )(features, queue_t)


class UnlabeledMatchingLayer:
    """JAX/Pallas port of the OIM unlabeled matching layer (forward only)."""

    def __init__(self, queue_size=5000, feat_len=256, queue_init=None,
                 compute_dtype=jnp.float32):
        # The PyTorch module registers a zero-initialized queue buffer; allow a
        # deterministic non-zero override so the kernel output is verifiable.
        # compute_dtype=jnp.bfloat16 halves HBM traffic on the queue read
        # (f32 accumulation is kept inside the kernel); use relaxed tolerances
        # when comparing against an f32 reference in that mode.
        self.compute_dtype = compute_dtype
        if queue_init is None:
            queue = jnp.zeros((queue_size, feat_len), jnp.float32)
        else:
            assert queue_init.shape == (queue_size, feat_len)
            queue = queue_init.astype(jnp.float32)
        # Store the persistent queue pre-transposed ([feat_len, queue_size]):
        # a one-time layout change, free amortized, removes the in-kernel .T.
        self.queue_t = queue.T.astype(compute_dtype)
        self.tail = jnp.array(0, jnp.int32)

    def __call__(self, features, pid_labels):
        # pid_labels only matter for the backward-time queue update.
        # TODO(synk): circular-queue writeback (backward-pass side effect) not
        # implemented; the forward pass does not depend on it.
        del pid_labels
        feats = features.astype(self.compute_dtype)
        return unlabeled_matching_forward(feats, self.queue_t)


if __name__ == "__main__":
    key = jax.random.PRNGKey(0)
    k_feat, k_queue, k_lbl = jax.random.split(key, 3)

    N, FEAT_LEN, QUEUE_SIZE = 8, 256, 512

    features = jax.random.normal(k_feat, (N, FEAT_LEN), jnp.float32)
    queue_init = jax.random.normal(k_queue, (QUEUE_SIZE, FEAT_LEN), jnp.float32)
    pid_labels = jax.random.randint(k_lbl, (N,), -1, 5, jnp.int32)

    ref = features @ queue_init.T

    # f32 path: exact parity with the PyTorch forward (tight tolerance).
    layer_f32 = UnlabeledMatchingLayer(
        queue_size=QUEUE_SIZE, feat_len=FEAT_LEN, queue_init=queue_init
    )
    scores_f32 = jax.block_until_ready(layer_f32(features, pid_labels))
    np.testing.assert_allclose(np.asarray(scores_f32), np.asarray(ref),
                               rtol=1e-5, atol=1e-5)

    # bf16-operand path: halves HBM traffic on the queue read (f32 accumulate);
    # inputs are quantized to bf16 so tolerance is relaxed.
    layer_bf16 = UnlabeledMatchingLayer(
        queue_size=QUEUE_SIZE, feat_len=FEAT_LEN, queue_init=queue_init,
        compute_dtype=jnp.bfloat16,
    )
    scores_bf16 = jax.block_until_ready(layer_bf16(features, pid_labels))
    np.testing.assert_allclose(np.asarray(scores_bf16), np.asarray(ref),
                               rtol=2e-2, atol=2e-1)

    print("KERNEL_OK")
</pallas_src>

<mosaic_0001>
module attributes {stable_mosaic.version = 11 : i64} {
  func.func @_unlabeled_matching_kernel(%arg0: i32, %arg1: memref<8x256xf32, #tpu.memory_space<vmem>>, %arg2: memref<256x512xf32, #tpu.memory_space<vmem>>, %arg3: memref<8x512xf32, #tpu.memory_space<vmem>>) attributes {dimension_semantics = [#tpu.dimension_semantics<parallel>], iteration_bounds = array<i64: 1>, scalar_prefetch = 0 : i64, scratch_operands = 0 : i64, tpu.core_type = #tpu.core_type<tc>, window_params = [{pipeline_mode = #tpu.pipeline_mode<synchronous>, transform_indices = @transform_0, window_bounds = array<i64: 8, 256>}, {transform_indices = @transform_1, window_bounds = array<i64: 256, 512>}, {transform_indices = @transform_2, window_bounds = array<i64: 8, 512>}]} {
    %c0 = arith.constant 0 : index
    %c0_0 = arith.constant 0 : index
    %0 = vector.load %arg1[%c0, %c0_0] : memref<8x256xf32, #tpu.memory_space<vmem>>, vector<8x256xf32>
    %c0_1 = arith.constant 0 : index
    %c0_2 = arith.constant 0 : index
    %1 = vector.load %arg2[%c0_1, %c0_2] : memref<256x512xf32, #tpu.memory_space<vmem>>, vector<256x512xf32>
    %cst = arith.constant dense<0.000000e+00> : vector<8x512xf32>
    %2 = tpu.matmul %0, %1, %cst {dimension_numbers = #tpu.dot_dimension_numbers<[1], [0], [0], [1], [0, 0, 1, 1], [], []>} : vector<8x256xf32>, vector<256x512xf32>, vector<8x512xf32> -> vector<8x512xf32>
    %c0_3 = arith.constant 0 : index
    %c0_4 = arith.constant 0 : index
    %3 = vector.load %arg3[%c0_3, %c0_4] : memref<8x512xf32, #tpu.memory_space<vmem>>, vector<8x512xf32>
    tpu.vector_store %arg3[%c0_3, %c0_4], %2 {strides = array<i32>} : memref<8x512xf32, #tpu.memory_space<vmem>>, vector<8x512xf32>,
    return
  }
  func.func @transform_0(%arg0: i32) -> (i32, i32) {
    %c0_i32 = arith.constant 0 : i32
    %c0_i32_0 = arith.constant 0 : i32
    %c0_i32_1 = arith.constant 0 : i32
    return %c0_i32, %c0_i32_0 : i32, i32
  }
  func.func @transform_1(%arg0: i32) -> (i32, i32) {
    %c0_i32 = arith.constant 0 : i32
    %c0_i32_0 = arith.constant 0 : i32
    return %c0_i32, %arg0 : i32, i32
  }
  func.func @transform_2(%arg0: i32) -> (i32, i32) {
    %c0_i32 = arith.constant 0 : i32
    %c0_i32_0 = arith.constant 0 : i32
    return %c0_i32, %arg0 : i32, i32
  }
}

</mosaic_0001>

<bundles_post_ra>
// kernel: tpu_custom_call.1
= control target key start
LH: loop header
LB: loop body
LE: loop exit
PB: predicated region body
PF: predicated region fallthrough
CT: control target
= control target key end

     0   :  { %7 = vsyncpa [#allocation3], 0  ;;  %s466_s0 = inlined_call_operand.hbm [shape: f32[8,256], index: 0, kind: input, shape index: {}]   ;;  %s467_s1 = inlined_call_operand.hbm [shape: f32[256,512], index: 1, kind: input, shape index: {}]   ;;  %s468_s2 = inlined_call_operand.hbm [shape: f32[8,512], index: 2, kind: output, shape index: {}]  }
   0x1   :  { %8 = vsyncpa [#allocation6], 0 }
   0x2   :  { %9 = vsyncpa [#allocation4], 0  ;;  %s15_s11 = sshll.u32 %s466_s0, 4  ;;  %s437_s12 = smov [#allocation2]   ;;  %s16_s11 = int_to_ptr.hbm [resolvable:$true] %s15_s11 }
   0x3   :  { %s17_s13 = sshll.u32 %s437_s12, 4  ;;  %s25_s16 = sshll.u32 %s467_s1, 4  ;;  %s18_s13 = int_to_ptr.vmem [resolvable:$true] %s17_s13  ;;  %s26_s16 = int_to_ptr.hbm [resolvable:$true] %s25_s16 }
   0x4   :  { %20 = dma.hbm_to_vmem [thread:$0]  %s16_s11, 256, %s18_s13, [#allocation3]  }
   0x5   :  { %s438_s17 = smov [#allocation5]   ;;  %s439_s19 = smov 512  }
   0x6   :  { %s27_s18 = sshll.u32 %s438_s17, 4  ;;  %s440_s20 = smov 32   ;;  %s28_s18 = int_to_ptr.vmem [resolvable:$true] %s27_s18 }
   0x7   :  { %33 = dma.hbm_to_vmem [thread:$0]  %s26_s16, 16384, %s28_s18, [#allocation6], %s439_s19, %s439_s19, %s440_s20  }
   0x8   :  { %431 = dma.done.wait [#allocation3], 256  }
   0x9   :  { %432 = vsyncadd [#allocation3], 4294967040 }
   0xa   :  { %433 = dma.done.wait [#allocation6], 16384  }
   0xb   :  { %434 = vsyncadd [#allocation6], 4294950912  ;;  %v105_v0 = vld [vmem:[#allocation5 + $0x1e8] sm:$0xff]  ;;  %v104_v6 = vld [vmem:[#allocation5 + $0x1e0] sm:$0xff]  ;;  %s441_s0 = smov [#allocation7]   ;;  %s343_s23 = sshll.u32 %s468_s2, 4  ;;  %s344_s23 = int_to_ptr.hbm [resolvable:$true] %s343_s23 }
   0xc   :  { %v169_v1 = vld [vmem:[#allocation5 + $0x3e8] sm:$0xff]  ;;  %212 = vmatpush.msra.mxu2 %v105_v0  ;;  %v168_v7 = vld [vmem:[#allocation5 + $0x3e0] sm:$0xff]  ;;  %172 = vmatpush.msra.mxu0 %v104_v6  ;;  %v107_v60 = vld [vmem:[#allocation5 + $0x1f8] sm:$0xff]  ;;  %s341_s1 = sshll.u32 %s441_s0, 4  ;;  %s342_s1 = int_to_ptr.vmem [resolvable:$true] %s341_s1 }
   0xd   :  { %v101_v2 = vld [vmem:[#allocation5 + $0x1c8] sm:$0xff]  ;;  %232 = vmatpush.msra.mxu3 %v169_v1  ;;  %v100_v8 = vld [vmem:[#allocation5 + $0x1c0] sm:$0xff]  ;;  %192 = vmatpush.msra.mxu1 %v168_v7  ;;  %v171_v61 = vld [vmem:[#allocation5 + $0x3f8] sm:$0xff] }
   0xe   :  { %v165_v3 = vld [vmem:[#allocation5 + $0x3c8] sm:$0xff]  ;;  %213 = vmatpush.msra.mxu2 %v101_v2  ;;  %v164_v9 = vld [vmem:[#allocation5 + $0x3c0] sm:$0xff]  ;;  %173 = vmatpush.msra.mxu0 %v100_v8  ;;  %v103_v0 = vld [vmem:[#allocation5 + $0x1d8] sm:$0xff] }
   0xf   :  { %v97_v4 = vld [vmem:[#allocation5 + $0x1a8] sm:$0xff]  ;;  %233 = vmatpush.msra.mxu3 %v165_v3  ;;  %v96_v12 = vld [vmem:[#allocation5 + $0x1a0] sm:$0xff]  ;;  %193 = vmatpush.msra.mxu1 %v164_v9  ;;  %v167_v1 = vld [vmem:[#allocation5 + $0x3d8] sm:$0xff] }
  0x10   :  { %v161_v5 = vld [vmem:[#allocation5 + $0x3a8] sm:$0xff]  ;;  %214 = vmatpush.msra.mxu2 %v97_v4  ;;  %v160_v13 = vld [vmem:[#allocation5 + $0x3a0] sm:$0xff]  ;;  %174 = vmatpush.msra.mxu0 %v96_v12  ;;  %v99_v4 = vld [vmem:[#allocation5 + $0x1b8] sm:$0xff] }
  0x11   :  { %v93_v10 = vld [vmem:[#allocation5 + $0x188] sm:$0xff]  ;;  %234 = vmatpush.msra.mxu3 %v161_v5  ;;  %v92_v16 = vld [vmem:[#allocation5 + $0x180] sm:$0xff]  ;;  %194 = vmatpush.msra.mxu1 %v160_v13  ;;  %v163_v5 = vld [vmem:[#allocation5 + $0x3b8] sm:$0xff] }
  0x12   :  { %v157_v11 = vld [vmem:[#allocation5 + $0x388] sm:$0xff]  ;;  %215 = vmatpush.msra.mxu2 %v93_v10  ;;  %v156_v17 = vld [vmem:[#allocation5 + $0x380] sm:$0xff]  ;;  %175 = vmatpush.msra.mxu0 %v92_v16  ;;  %v106_v6 = vld [vmem:[#allocation5 + $0x1f0] sm:$0xff] }
  0x13   :  { %v89_v14 = vld [vmem:[#allocation5 + $0x168] sm:$0xff]  ;;  %235 = vmatpush.msra.mxu3 %v157_v11  ;;  %v88_v20 = vld [vmem:[#allocation5 + $0x160] sm:$0xff]  ;;  %195 = vmatpush.msra.mxu1 %v156_v17  ;;  %v170_v7 = vld [vmem:[#allocation5 + $0x3f0] sm:$0xff] }
  0x14   :  { %v153_v15 = vld [vmem:[#allocation5 + $0x368] sm:$0xff]  ;;  %216 = vmatpush.msra.mxu2 %v89_v14  ;;  %v152_v21 = vld [vmem:[#allocation5 + $0x360] sm:$0xff]  ;;  %176 = vmatpush.msra.mxu0 %v88_v20  ;;  %v95_v8 = vld [vmem:[#allocation5 + $0x198] sm:$0xff] }
  0x15   :  { %v85_v18 = vld [vmem:[#allocation5 + $0x148] sm:$0xff]  ;;  %236 = vmatpush.msra.mxu3 %v153_v15  ;;  %v84_v24 = vld [vmem:[#allocation5 + $0x140] sm:$0xff]  ;;  %196 = vmatpush.msra.mxu1 %v152_v21  ;;  %v159_v9 = vld [vmem:[#allocation5 + $0x398] sm:$0xff] }
  0x16   :  { %v149_v19 = vld [vmem:[#allocation5 + $0x348] sm:$0xff]  ;;  %217 = vmatpush.msra.mxu2 %v85_v18  ;;  %v148_v25 = vld [vmem:[#allocation5 + $0x340] sm:$0xff]  ;;  %177 = vmatpush.msra.mxu0 %v84_v24  ;;  %v102_v10 = vld [vmem:[#allocation5 + $0x1d0] sm:$0xff] }
  0x17   :  { %v81_v22 = vld [vmem:[#allocation5 + $0x128] sm:$0xff]  ;;  %237 = vmatpush.msra.mxu3 %v149_v19  ;;  %v80_v28 = vld [vmem:[#allocation5 + $0x120] sm:$0xff]  ;;  %197 = vmatpush.msra.mxu1 %v148_v25  ;;  %v166_v11 = vld [vmem:[#allocation5 + $0x3d0] sm:$0xff] }
  0x18   :  { %v145_v23 = vld [vmem:[#allocation5 + $0x328] sm:$0xff]  ;;  %218 = vmatpush.msra.mxu2 %v81_v22  ;;  %v144_v29 = vld [vmem:[#allocation5 + $0x320] sm:$0xff]  ;;  %178 = vmatpush.msra.mxu0 %v80_v28  ;;  %v91_v12 = vld [vmem:[#allocation5 + $0x178] sm:$0xff] }
  0x19   :  { %v77_v26 = vld [vmem:[#allocation5 + $0x108] sm:$0xff]  ;;  %238 = vmatpush.msra.mxu3 %v145_v23  ;;  %v76_v32 = vld [vmem:[#allocation5 + $0x100] sm:$0xff]  ;;  %198 = vmatpush.msra.mxu1 %v144_v29  ;;  %v155_v13 = vld [vmem:[#allocation5 + $0x378] sm:$0xff] }
  0x1a   :  { %v141_v27 = vld [vmem:[#allocation5 + $0x308] sm:$0xff]  ;;  %219 = vmatpush.msra.mxu2 %v77_v26  ;;  %v140_v33 = vld [vmem:[#allocation5 + $0x300] sm:$0xff]  ;;  %179 = vmatpush.msra.mxu0 %v76_v32  ;;  %v98_v14 = vld [vmem:[#allocation5 + $0x1b0] sm:$0xff] }
  0x1b   :  { %v73_v30 = vld [vmem:[#allocation5 + $0xe8] sm:$0xff]  ;;  %239 = vmatpush.msra.mxu3 %v141_v27  ;;  %v72_v36 = vld [vmem:[#allocation5 + $0xe0] sm:$0xff]  ;;  %199 = vmatpush.msra.mxu1 %v140_v33  ;;  %v162_v15 = vld [vmem:[#allocation5 + $0x3b0] sm:$0xff] }
  0x1c   :  { %v137_v31 = vld [vmem:[#allocation5 + $0x2e8] sm:$0xff]  ;;  %220 = vmatpush.msra.mxu2 %v73_v30  ;;  %v136_v37 = vld [vmem:[#allocation5 + $0x2e0] sm:$0xff]  ;;  %180 = vmatpush.msra.mxu0 %v72_v36  ;;  %v87_v16 = vld [vmem:[#allocation5 + $0x158] sm:$0xff] }
  0x1d   :  { %v69_v34 = vld [vmem:[#allocation5 + $0xc8] sm:$0xff]  ;;  %240 = vmatpush.msra.mxu3 %v137_v31  ;;  %v68_v40 = vld [vmem:[#allocation5 + $0xc0] sm:$0xff]  ;;  %200 = vmatpush.msra.mxu1 %v136_v37  ;;  %v151_v17 = vld [vmem:[#allocation5 + $0x358] sm:$0xff] }
  0x1e   :  { %v133_v35 = vld [vmem:[#allocation5 + $0x2c8] sm:$0xff]  ;;  %221 = vmatpush.msra.mxu2 %v69_v34  ;;  %v132_v41 = vld [vmem:[#allocation5 + $0x2c0] sm:$0xff]  ;;  %181 = vmatpush.msra.mxu0 %v68_v40  ;;  %v94_v18 = vld [vmem:[#allocation5 + $0x190] sm:$0xff] }
  0x1f   :  { %v65_v38 = vld [vmem:[#allocation5 + $0xa8] sm:$0xff]  ;;  %241 = vmatpush.msra.mxu3 %v133_v35  ;;  %v64_v44 = vld [vmem:[#allocation5 + $0xa0] sm:$0xff]  ;;  %201 = vmatpush.msra.mxu1 %v132_v41  ;;  %v158_v19 = vld [vmem:[#allocation5 + $0x390] sm:$0xff] }
  0x20   :  { %v129_v39 = vld [vmem:[#allocation5 + $0x2a8] sm:$0xff]  ;;  %222 = vmatpush.msra.mxu2 %v65_v38  ;;  %v128_v45 = vld [vmem:[#allocation5 + $0x2a0] sm:$0xff]  ;;  %182 = vmatpush.msra.mxu0 %v64_v44  ;;  %v83_v20 = vld [vmem:[#allocation5 + $0x138] sm:$0xff] }
  0x21   :  { %v61_v42 = vld [vmem:[#allocation5 + $0x88] sm:$0xff]  ;;  %242 = vmatpush.msra.mxu3 %v129_v39  ;;  %v60_v48 = vld [vmem:[#allocation5 + $0x80] sm:$0xff]  ;;  %202 = vmatpush.msra.mxu1 %v128_v45  ;;  %v147_v21 = vld [vmem:[#allocation5 + $0x338] sm:$0xff] }
  0x22   :  { %v125_v43 = vld [vmem:[#allocation5 + $0x288] sm:$0xff]  ;;  %223 = vmatpush.msra.mxu2 %v61_v42  ;;  %v124_v49 = vld [vmem:[#allocation5 + $0x280] sm:$0xff]  ;;  %183 = vmatpush.msra.mxu0 %v60_v48  ;;  %v90_v22 = vld [vmem:[#allocation5 + $0x170] sm:$0xff] }
  0x23   :  { %v57_v46 = vld [vmem:[#allocation5 + $0x68] sm:$0xff]  ;;  %243 = vmatpush.msra.mxu3 %v125_v43  ;;  %v56_v52 = vld [vmem:[#allocation5 + $0x60] sm:$0xff]  ;;  %203 = vmatpush.msra.mxu1 %v124_v49  ;;  %v154_v23 = vld [vmem:[#allocation5 + $0x370] sm:$0xff] }
  0x24   :  { %v121_v47 = vld [vmem:[#allocation5 + $0x268] sm:$0xff]  ;;  %224 = vmatpush.msra.mxu2 %v57_v46  ;;  %v120_v53 = vld [vmem:[#allocation5 + $0x260] sm:$0xff]  ;;  %184 = vmatpush.msra.mxu0 %v56_v52  ;;  %v79_v24 = vld [vmem:[#allocation5 + $0x118] sm:$0xff] }
  0x25   :  { %v53_v50 = vld [vmem:[#allocation5 + $0x48] sm:$0xff]  ;;  %244 = vmatpush.msra.mxu3 %v121_v47  ;;  %v52_v56 = vld [vmem:[#allocation5 + $0x40] sm:$0xff]  ;;  %204 = vmatpush.msra.mxu1 %v120_v53  ;;  %v143_v25 = vld [vmem:[#allocation5 + $0x318] sm:$0xff] }
  0x26   :  { %v117_v51 = vld [vmem:[#allocation5 + $0x248] sm:$0xff]  ;;  %225 = vmatpush.msra.mxu2 %v53_v50  ;;  %v116_v57 = vld [vmem:[#allocation5 + $0x240] sm:$0xff]  ;;  %185 = vmatpush.msra.mxu0 %v52_v56  ;;  %v86_v26 = vld [vmem:[#allocation5 + $0x150] sm:$0xff] }
  0x27   :  { %v49_v54 = vld [vmem:[#allocation5 + $0x28] sm:$0xff]  ;;  %245 = vmatpush.msra.mxu3 %v117_v51  ;;  %205 = vmatpush.msra.mxu1 %v116_v57  ;;  %v48_v62 = vld [vmem:[#allocation5 + $0x20] sm:$0xff]  ;;  %v150_v27 = vld [vmem:[#allocation5 + $0x350] sm:$0xff] }
  0x28   :  { %v113_v55 = vld [vmem:[#allocation5 + $0x228] sm:$0xff]  ;;  %226 = vmatpush.msra.mxu2 %v49_v54  ;;  %v112_v63 = vld [vmem:[#allocation5 + $0x220] sm:$0xff]  ;;  %186 = vmatpush.msra.mxu0 %v48_v62  ;;  %v75_v28 = vld [vmem:[#allocation5 + $0xf8] sm:$0xff] }
  0x29   :  { %v45_v58 = vld [vmem:[#allocation5 + $0x8] sm:$0xff]  ;;  %246 = vmatpush.msra.mxu3 %v113_v55  ;;  %v44_v2 = vld [vmem:[#allocation5] sm:$0xff]  ;;  %206 = vmatpush.msra.mxu1 %v112_v63  ;;  %v139_v29 = vld [vmem:[#allocation5 + $0x2f8] sm:$0xff] }
  0x2a   :  { %v109_v59 = vld [vmem:[#allocation5 + $0x208] sm:$0xff]  ;;  %227 = vmatpush.msra.mxu2 %v45_v58  ;;  %v108_v3 = vld [vmem:[#allocation5 + $0x200] sm:$0xff]  ;;  %187 = vmatpush.msra.mxu0 %v44_v2  ;;  %v82_v30 = vld [vmem:[#allocation5 + $0x130] sm:$0xff] }
  0x2b   :  { %247 = vmatpush.msra.mxu3 %v109_v59  ;;  %207 = vmatpush.msra.mxu1 %v108_v3  ;;  %v146_v31 = vld [vmem:[#allocation5 + $0x330] sm:$0xff]  ;;  %v71_v32 = vld [vmem:[#allocation5 + $0xd8] sm:$0xff] }
  0x2c   :  { %292 = vmatpush.msrb.mxu2 %v107_v60  ;;  %252 = vmatpush.msrb.mxu0 %v106_v6  ;;  %v135_v33 = vld [vmem:[#allocation5 + $0x2d8] sm:$0xff]  ;;  %v78_v34 = vld [vmem:[#allocation5 + $0x110] sm:$0xff] }
  0x2d   :  { %312 = vmatpush.msrb.mxu3 %v171_v61  ;;  %272 = vmatpush.msrb.mxu1 %v170_v7  ;;  %v142_v35 = vld [vmem:[#allocation5 + $0x310] sm:$0xff]  ;;  %v67_v36 = vld [vmem:[#allocation5 + $0xb8] sm:$0xff] }
  0x2e   :  { %293 = vmatpush.msrb.mxu2 %v103_v0  ;;  %253 = vmatpush.msrb.mxu0 %v102_v10  ;;  %v131_v37 = vld [vmem:[#allocation5 + $0x2b8] sm:$0xff]  ;;  %v74_v38 = vld [vmem:[#allocation5 + $0xf0] sm:$0xff] }
  0x2f   :  { %313 = vmatpush.msrb.mxu3 %v167_v1  ;;  %273 = vmatpush.msrb.mxu1 %v166_v11  ;;  %v138_v39 = vld [vmem:[#allocation5 + $0x2f0] sm:$0xff]  ;;  %v63_v40 = vld [vmem:[#allocation5 + $0x98] sm:$0xff] }
  0x30   :  { %294 = vmatpush.msrb.mxu2 %v99_v4  ;;  %254 = vmatpush.msrb.mxu0 %v98_v14  ;;  %v127_v41 = vld [vmem:[#allocation5 + $0x298] sm:$0xff]  ;;  %v42_v42 = vld [vmem:[#allocation2] sm:$0xff] }
  0x31   :  { %314 = vmatpush.msrb.mxu3 %v163_v5  ;;  %274 = vmatpush.msrb.mxu1 %v162_v15  ;;  %v43_v43 = vld [vmem:[#allocation2 + $0x8] sm:$0xff]  ;;  %v70_v44 = vld [vmem:[#allocation5 + $0xd0] sm:$0xff] }
  0x32   :  { %295 = vmatpush.msrb.mxu2 %v95_v8  ;;  %255 = vmatpush.msrb.mxu0 %v94_v18  ;;  %v134_v45 = vld [vmem:[#allocation5 + $0x2d0] sm:$0xff]  ;;  %v59_v46 = vld [vmem:[#allocation5 + $0x78] sm:$0xff] }
  0x33   :  { %315 = vmatpush.msrb.mxu3 %v159_v9  ;;  %275 = vmatpush.msrb.mxu1 %v158_v19  ;;  %v123_v47 = vld [vmem:[#allocation5 + $0x278] sm:$0xff]  ;;  %v66_v48 = vld [vmem:[#allocation5 + $0xb0] sm:$0xff] }
  0x34   :  { %296 = vmatpush.msrb.mxu2 %v91_v12  ;;  %256 = vmatpush.msrb.mxu0 %v90_v22  ;;  %v130_v49 = vld [vmem:[#allocation5 + $0x2b0] sm:$0xff]  ;;  %v55_v50 = vld [vmem:[#allocation5 + $0x58] sm:$0xff] }
  0x35   :  { %316 = vmatpush.msrb.mxu3 %v155_v13  ;;  %276 = vmatpush.msrb.mxu1 %v154_v23  ;;  %v119_v51 = vld [vmem:[#allocation5 + $0x258] sm:$0xff]  ;;  %v62_v52 = vld [vmem:[#allocation5 + $0x90] sm:$0xff] }
  0x36   :  { %297 = vmatpush.msrb.mxu2 %v87_v16  ;;  %257 = vmatpush.msrb.mxu0 %v86_v26  ;;  %v126_v53 = vld [vmem:[#allocation5 + $0x290] sm:$0xff]  ;;  %v51_v54 = vld [vmem:[#allocation5 + $0x38] sm:$0xff] }
  0x37   :  { %317 = vmatpush.msrb.mxu3 %v151_v17  ;;  %277 = vmatpush.msrb.mxu1 %v150_v27  ;;  %v115_v55 = vld [vmem:[#allocation5 + $0x238] sm:$0xff]  ;;  %v58_v56 = vld [vmem:[#allocation5 + $0x70] sm:$0xff] }
  0x38   :  { %298 = vmatpush.msrb.mxu2 %v83_v20  ;;  %258 = vmatpush.msrb.mxu0 %v82_v30  ;;  %v122_v57 = vld [vmem:[#allocation5 + $0x270] sm:$0xff]  ;;  %v47_v58 = vld [vmem:[#allocation5 + $0x18] sm:$0xff] }
  0x39   :  { %318 = vmatpush.msrb.mxu3 %v147_v21  ;;  %278 = vmatpush.msrb.mxu1 %v146_v31  ;;  %v111_v59 = vld [vmem:[#allocation5 + $0x218] sm:$0xff]  ;;  %v54_v60 = vld [vmem:[#allocation5 + $0x50] sm:$0xff] }
  0x3a   :  { %299 = vmatpush.msrb.mxu2 %v79_v24  ;;  %259 = vmatpush.msrb.mxu0 %v78_v34  ;;  %v118_v61 = vld [vmem:[#allocation5 + $0x250] sm:$0xff] }
  0x3b   :  { %319 = vmatpush.msrb.mxu3 %v143_v25  ;;  %279 = vmatpush.msrb.mxu1 %v142_v35  ;;  %v50_v62 = vld [vmem:[#allocation5 + $0x30] sm:$0xff] }
  0x3c   :  { %300 = vmatpush.msrb.mxu2 %v75_v28  ;;  %260 = vmatpush.msrb.mxu0 %v74_v38  ;;  %v114_v63 = vld [vmem:[#allocation5 + $0x230] sm:$0xff] }
  0x3d   :  { %320 = vmatpush.msrb.mxu3 %v139_v29  ;;  %280 = vmatpush.msrb.mxu1 %v138_v39  ;;  %v46_v0 = vld [vmem:[#allocation5 + $0x10] sm:$0xff] }
  0x3e   :  { %301 = vmatpush.msrb.mxu2 %v71_v32  ;;  %248 = vmatmul.f32.vlgmr.msra.gmra.mxu3 %v43_v43  ;;  %v110_v1 = vld [vmem:[#allocation5 + $0x210] sm:$0xff] }
  0x3f   :  { %321 = vmatpush.msrb.mxu3 %v135_v33  ;;  %228 = vmatmul.f32.vlgmr.msra.gmra.mxu2 %v42_v42 }
  0x40   :  { %302 = vmatpush.msrb.mxu2 %v67_v36  ;;  %261 = vmatpush.msrb.mxu0 %v70_v44 }
  0x41   :  { %322 = vmatpush.msrb.mxu3 %v131_v37  ;;  %281 = vmatpush.msrb.mxu1 %v134_v45 }
  0x42   :  { %303 = vmatpush.msrb.mxu2 %v63_v40  ;;  %262 = vmatpush.msrb.mxu0 %v66_v48 }
  0x43   :  { %323 = vmatpush.msrb.mxu3 %v127_v41  ;;  %282 = vmatpush.msrb.mxu1 %v130_v49 }
  0x44   :  { %304 = vmatpush.msrb.mxu2 %v59_v46  ;;  %263 = vmatpush.msrb.mxu0 %v62_v52 }
  0x45   :  { %324 = vmatpush.msrb.mxu3 %v123_v47  ;;  %283 = vmatpush.msrb.mxu1 %v126_v53 }
  0x46   :  { %305 = vmatpush.msrb.mxu2 %v55_v50  ;;  %188 = vmatmul.f32.vlgmr.msra.gmra.mxu0 %v42_v42 }
  0x47   :  { %325 = vmatpush.msrb.mxu3 %v119_v51  ;;  %208 = vmatmul.f32.vlgmr.msra.gmra.mxu1 %v43_v43 }
  0x48   :  { %306 = vmatpush.msrb.mxu2 %v51_v54  ;;  %264 = vmatpush.msrb.mxu0 %v58_v56 }
  0x49   :  { %326 = vmatpush.msrb.mxu3 %v115_v55  ;;  %284 = vmatpush.msrb.mxu1 %v122_v57 }
  0x4a   :  { %307 = vmatpush.msrb.mxu2 %v47_v58  ;;  %265 = vmatpush.msrb.mxu0 %v54_v60 }
  0x4b   :  { %327 = vmatpush.msrb.mxu3 %v111_v59  ;;  %308 = vmatmul.f32.vlgmr.msrb.gmra.mxu2 %v42_v42 }
  0x4c   :  { %328 = vmatmul.f32.vlgmr.msrb.gmra.mxu3 %v43_v43  ;;  %285 = vmatpush.msrb.mxu1 %v118_v61 }
  0x4d   :  { %266 = vmatpush.msrb.mxu0 %v50_v62 }
  0x4e   :  { %286 = vmatpush.msrb.mxu1 %v114_v63 }
  0x4f   :  { %267 = vmatpush.msrb.mxu0 %v46_v0 }
  0x50   :  { %287 = vmatpush.msrb.mxu1 %v110_v1  ;;  %268 = vmatmul.f32.vlgmr.msrb.gmra.mxu0 %v42_v42 }
  0x51   :  { %288 = vmatmul.f32.vlgmr.msrb.gmra.mxu1 %v43_v43 }
  0xc1   :  { %v249_v3 = vpop.f32.mrf.mxu3 }
  0xc2   :  { %v229_v2 = vpop.f32.mrf.mxu2 }
  0xc3   :  { %v189_v4 = vpop.f32.mrf.mxu0  ;;  %v250_v6 = vadd.f32 %v249_v3, %v229_v2 }
  0xc4   :  { %v209_v5 = vpop.f32.mrf.mxu1 }
  0xc5   :  { %v210_v7 = vadd.f32 %v209_v5, %v189_v4  ;;  %333 = vst [vmem:[#allocation7 + $0x8] sm:$0xff] %v250_v6 }
  0xc7   :  { %332 = vst [vmem:[#allocation7] sm:$0xff] %v210_v7 }
  0xcd   :  { %v269_v8 = vpop.f32.mrf.mxu0 }
  0xce   :  { %v289_v9 = vpop.f32.mrf.mxu1  ;;  %v309_v11 = vpop.f32.mrf.mxu2 }
  0xcf   :  { %v290_v10 = vadd.f32 %v289_v9, %v269_v8  ;;  %v329_v12 = vpop.f32.mrf.mxu3 }
  0xd0   :  { %v330_v13 = vadd.f32 %v329_v12, %v309_v11 }
  0xd1   :  { %334 = vst [vmem:[#allocation7 + $0x10] sm:$0xff] %v290_v10 }
  0xd2   :  { %335 = vst [vmem:[#allocation7 + $0x18] sm:$0xff] %v330_v13 }
  0xd3   :  { %346 = dma.vmem_to_hbm [thread:$0]  %s342_s1, 512, %s344_s23, [#allocation4]  }
  0xd4   :  { %435 = dma.done.wait [#allocation4], 512  }
  0xd5   :  { %436 = vsyncadd [#allocation4], 4294966784 }
  0xd6   :  { %351 = vsyncpa [#allocation3], 1 }
  0xd7   :  { %352 = vsyncpa [#allocation6], 1 }
  0xd8   :  { %353 = vsyncpa [#allocation4], 1 }

</bundles_post_ra>
